<compile_context>
chip_gen: v5e
topology: v5e:2x2
jax: 0.10.0
libtpu: 0.0.40
codegen_flags: <defaults>
</compile_context>

<pallas_src>
import functools

import jax
import jax.numpy as jnp
from jax.experimental import pallas as pl
from jax.experimental.pallas import tpu as pltpu


# --------------------------------------------------------------------------
# Pallas kernel 1: row-tiled matmul + bias (stem im2col conv, 1x1 convs, FC)
# --------------------------------------------------------------------------
def _matmul_bias_kernel(a_ref, b_ref, bias_ref, o_ref):
    a = a_ref[...].astype(jnp.bfloat16)              # activations f32 in HBM -> bf16 at MXU
    o_ref[...] = (jnp.dot(a, b_ref[...], preferred_element_type=jnp.float32)
                  + bias_ref[...])


def matmul_bias(a, b_bf16, bias, tm=256):
    """out = a @ b + bias.  a: (M, K) f32, b_bf16: (K, N) bf16, bias: (N,) f32."""
    M, K = a.shape
    K2, N = b_bf16.shape
    assert K == K2
    TM = M if M <= tm else tm                        # full dim or 8-aligned tile
    bias2 = bias.reshape(1, N).astype(jnp.float32)
    return pl.pallas_call(
        _matmul_bias_kernel,
        out_shape=jax.ShapeDtypeStruct((M, N), jnp.float32),
        grid=(pl.cdiv(M, TM),),
        in_specs=[pl.BlockSpec((TM, K), lambda i: (i, 0)),
                  pl.BlockSpec((K, N), lambda i: (0, 0)),
                  pl.BlockSpec((1, N), lambda i: (0, 0))],
        out_specs=pl.BlockSpec((TM, N), lambda i: (i, 0)),
        compiler_params=pltpu.CompilerParams(
            dimension_semantics=("parallel",)),
    )(a, b_bf16, bias2)


# --------------------------------------------------------------------------
# Pallas kernel 2: BatchNorm batch statistics (tiled reduction over pixels)
# --------------------------------------------------------------------------
def _bn_stats_kernel(x_ref, s_ref, q_ref, *, m_real, tm, need_mask):
    i = pl.program_id(0)
    x = x_ref[...]                                   # (TM, C) f32
    if need_mask:                                    # only emitted for ragged tails
        rows = jax.lax.broadcasted_iota(jnp.int32, x.shape, 0) + i * tm
        x = jnp.where(rows < m_real, x, 0.0)

    @pl.when(i == 0)
    def _():
        s_ref[...] = jnp.zeros_like(s_ref)
        q_ref[...] = jnp.zeros_like(q_ref)

    s_ref[...] += jnp.sum(x, axis=0, keepdims=True)
    q_ref[...] += jnp.sum(x * x, axis=0, keepdims=True)


def bn_scale_shift(x2, gamma, beta, eps=1e-5, tm=512):
    """x2: (M, C). Returns per-channel (scale, shift) for train-mode BN."""
    M, C = x2.shape
    TM = M if M <= tm else tm
    need_mask = (M % TM) != 0
    kern = functools.partial(_bn_stats_kernel, m_real=M, tm=TM, need_mask=need_mask)
    s, q = pl.pallas_call(
        kern,
        out_shape=(jax.ShapeDtypeStruct((1, C), jnp.float32),
                   jax.ShapeDtypeStruct((1, C), jnp.float32)),
        grid=(pl.cdiv(M, TM),),
        in_specs=[pl.BlockSpec((TM, C), lambda i: (i, 0))],
        out_specs=(pl.BlockSpec((1, C), lambda i: (0, 0)),
                   pl.BlockSpec((1, C), lambda i: (0, 0))),
        compiler_params=pltpu.CompilerParams(
            dimension_semantics=("arbitrary",)),
    )(x2)
    mean = s[0] / M
    var = q[0] / M - mean * mean                     # biased batch variance (PyTorch fwd)
    scale = gamma * jax.lax.rsqrt(var + eps)
    shift = beta - mean * scale
    return scale, shift


# --------------------------------------------------------------------------
# Pallas kernel 3: fused BN+ReLU + 3x3 conv (shift-and-accumulate, no im2col)
# --------------------------------------------------------------------------
def _conv3x3_bnrelu_kernel(x_ref, w_ref, sc_ref, sh_ref, b_ref, o_ref, *, H, W):
    Hp, Wp = H + 2, W + 2
    Cin = x_ref.shape[-1]
    Cout = o_ref.shape[-1]

    x = x_ref[0]                                     # (Hp, Wp, Cin) zero-padded, f32
    a = jnp.maximum(x * sc_ref[...] + sh_ref[...], 0.0)   # BN affine + ReLU
    # conv padding is applied AFTER BN+ReLU in the reference -> zero the halo positions
    hio = jax.lax.broadcasted_iota(jnp.int32, (Hp, Wp, Cin), 0)
    wio = jax.lax.broadcasted_iota(jnp.int32, (Hp, Wp, Cin), 1)
    valid = (hio >= 1) & (hio <= H) & (wio >= 1) & (wio <= W)
    a = jnp.where(valid, a, 0.0).astype(jnp.bfloat16)

    acc = jnp.zeros((H * W, Cout), jnp.float32)
    for di in range(3):
        for dj in range(3):
            win = a[di:di + H, dj:dj + W, :].reshape(H * W, Cin)
            acc = acc + jnp.dot(win, w_ref[di, dj],
                                preferred_element_type=jnp.float32)
    acc = acc + b_ref[...]
    o_ref[...] = acc.reshape(1, H, W, Cout)


def conv3x3_bn_relu(x, w_bf16, bias, scale, shift):
    """x: (N,H,W,Cin) f32; w_bf16: (3,3,Cin,Cout) bf16. Returns (N,H,W,Cout) f32."""
    N, H, W, Cin = x.shape
    Cout = w_bf16.shape[-1]
    xp = jnp.pad(x, ((0, 0), (1, 1), (1, 1), (0, 0)))
    kern = functools.partial(_conv3x3_bnrelu_kernel, H=H, W=W)
    return pl.pallas_call(
        kern,
        out_shape=jax.ShapeDtypeStruct((N, H, W, Cout), jnp.float32),
        grid=(N,),
        in_specs=[pl.BlockSpec((1, H + 2, W + 2, Cin), lambda n: (n, 0, 0, 0)),
                  pl.BlockSpec((3, 3, Cin, Cout), lambda n: (0, 0, 0, 0)),
                  pl.BlockSpec((1, Cin), lambda n: (0, 0)),
                  pl.BlockSpec((1, Cin), lambda n: (0, 0)),
                  pl.BlockSpec((1, Cout), lambda n: (0, 0))],
        out_specs=pl.BlockSpec((1, H, W, Cout), lambda n: (n, 0, 0, 0)),
        compiler_params=pltpu.CompilerParams(
            dimension_semantics=("parallel",)),
    )(xp, w_bf16,
      scale.reshape(1, Cin).astype(jnp.float32),
      shift.reshape(1, Cin).astype(jnp.float32),
      bias.reshape(1, Cout).astype(jnp.float32))


# --------------------------------------------------------------------------
# Pallas kernel 4: tiled window reduction (max / avg / global-avg pool)
# --------------------------------------------------------------------------
def _pool_kernel(w_ref, o_ref, *, op):
    w = w_ref[...]                                   # (KK, TM, C)
    if op == "max":
        o_ref[...] = jnp.max(w, axis=0)
    else:
        o_ref[...] = jnp.mean(w, axis=0)


def pool_reduce(windows, op, tm=512):
    """windows: (KK, M, C) -> (M, C) reduced over axis 0, tiled over M."""
    KK, M, C = windows.shape
    TM = M if M <= tm else tm
    kern = functools.partial(_pool_kernel, op=op)
    return pl.pallas_call(
        kern,
        out_shape=jax.ShapeDtypeStruct((M, C), jnp.float32),
        grid=(pl.cdiv(M, TM),),
        in_specs=[pl.BlockSpec((KK, TM, C), lambda i: (0, i, 0))],
        out_specs=pl.BlockSpec((TM, C), lambda i: (i, 0)),
        compiler_params=pltpu.CompilerParams(
            dimension_semantics=("parallel",)),
    )(windows)


# --------------------------------------------------------------------------
# Plain-JAX glue: window/patch extraction, layer wrappers
# --------------------------------------------------------------------------
def _extract_windows(x, kh, kw, stride, pad, pad_value):
    """x: (N, H, W, C) -> (kh*kw, N, Ho, Wo, C) of shifted strided views."""
    N, H, W, C = x.shape
    xp = jnp.pad(x, ((0, 0), (pad, pad), (pad, pad), (0, 0)),
                 constant_values=pad_value)
    Ho = (H + 2 * pad - kh) // stride + 1
    Wo = (W + 2 * pad - kw) // stride + 1
    wins = []
    for di in range(kh):
        for dj in range(kw):
            sl = jax.lax.slice(
                xp,
                (0, di, dj, 0),
                (N, di + (Ho - 1) * stride + 1, dj + (Wo - 1) * stride + 1, C),
                (1, stride, stride, 1))
            wins.append(sl)
    return jnp.stack(wins, axis=0), Ho, Wo


def conv_im2col(x, w, b, stride, pad):
    """Stem conv only (7x7/s2, Cin=3, runs once): im2col + tiled matmul."""
    kh, kw, Cin, Cout = w.shape
    wins, Ho, Wo = _extract_windows(x, kh, kw, stride, pad, 0.0)
    KK = kh * kw
    N = x.shape[0]
    patches = jnp.transpose(wins, (1, 2, 3, 0, 4)).reshape(N * Ho * Wo, KK * Cin)
    out = matmul_bias(patches, w.reshape(KK * Cin, Cout).astype(jnp.bfloat16), b)
    return out.reshape(N, Ho, Wo, Cout)


def maxpool2d_3x3_s2_p1(x):
    wins, Ho, Wo = _extract_windows(x, 3, 3, 2, 1, -jnp.inf)
    KK, N = wins.shape[0], wins.shape[1]
    C = wins.shape[-1]
    out = pool_reduce(wins.reshape(KK, N * Ho * Wo, C), "max")
    return out.reshape(N, Ho, Wo, C)


def avgpool2d_2x2(x):
    wins, Ho, Wo = _extract_windows(x, 2, 2, 2, 0, 0.0)
    KK, N = wins.shape[0], wins.shape[1]
    C = wins.shape[-1]
    out = pool_reduce(wins.reshape(KK, N * Ho * Wo, C), "mean")
    return out.reshape(N, Ho, Wo, C)


def global_avgpool(x):
    N, H, W, C = x.shape
    wins = jnp.transpose(x, (1, 2, 0, 3)).reshape(H * W, N, C)
    return pool_reduce(wins, "mean")                 # (N, C)


def dense_layer(x, gamma, beta, w, b):
    """One DenseNet basic layer: BN -> ReLU -> Conv3x3 (BN fused into the conv)."""
    N, H, W, Cin = x.shape
    scale, shift = bn_scale_shift(x.reshape(N * H * W, Cin), gamma, beta)
    return conv3x3_bn_relu(x, w.astype(jnp.bfloat16), b, scale, shift)


def downsample(x, gamma, beta, w, b):
    """BN (no ReLU, folded into weights) -> Conv1x1 -> AvgPool2d(2)."""
    N, H, W, Cin = x.shape
    Cout = w.shape[-1]
    x2 = x.reshape(N * H * W, Cin)
    scale, shift = bn_scale_shift(x2, gamma, beta)
    w2 = w.reshape(Cin, Cout)
    w_eff = (scale[:, None] * w2).astype(jnp.bfloat16)
    b_eff = shift @ w2 + b
    h = matmul_bias(x2, w_eff, b_eff).reshape(N, H, W, Cout)
    return avgpool2d_2x2(h)


# --------------------------------------------------------------------------
# Parameter construction (deterministic, in-script)
# --------------------------------------------------------------------------
def _init_conv(key, kh, kw, cin, cout):
    k1, k2 = jax.random.split(key)
    w = 0.05 * jax.random.normal(k1, (kh, kw, cin, cout), jnp.float32)
    b = 0.05 * jax.random.normal(k2, (cout,), jnp.float32)
    return w, b


def _init_bn(c):
    return jnp.ones((c,), jnp.float32), jnp.zeros((c,), jnp.float32)


ARCHITECTURES = {'121': [6, 12, 24, 16], '169': [6, 12, 32, 32],
                 '201': [6, 12, 48, 32], '264': [6, 12, 64, 48]}


def build_densenet_params(key, k, theta, archi, num_classes):
    num_layers = ARCHITECTURES[archi]
    in_ch = 2 * k
    key, sub = jax.random.split(key)
    params = {'stem_conv': _init_conv(sub, 7, 7, 3, in_ch), 'blocks': []}
    for i, nl in enumerate(num_layers):
        dense_layers = []
        for j in range(nl):
            cin = in_ch + k * j
            key, sub = jax.random.split(key)
            dense_layers.append({'bn': _init_bn(cin),
                                 'conv': _init_conv(sub, 3, 3, cin, k)})
        in_ch = in_ch + nl * k
        stage = {'dense': dense_layers}
        if i != len(num_layers) - 1:
            out_ch = int(theta * in_ch)
            key, sub = jax.random.split(key)
            stage['down'] = {'bn': _init_bn(in_ch),
                             'conv': _init_conv(sub, 1, 1, in_ch, out_ch)}
            in_ch = out_ch
        params['blocks'].append(stage)
    key, sub = jax.random.split(key)
    k1, k2 = jax.random.split(sub)
    params['fc'] = (0.05 * jax.random.normal(k1, (in_ch, num_classes), jnp.float32),
                    0.05 * jax.random.normal(k2, (num_classes,), jnp.float32))
    return params


# --------------------------------------------------------------------------
# Forward pass (matches DenseNet_ImageNet.forward)
# --------------------------------------------------------------------------
def densenet_forward(params, x_nchw):
    x = jnp.transpose(x_nchw, (0, 2, 3, 1)).astype(jnp.float32)   # NCHW -> NHWC

    # stem: Conv2d(3, 2k, k=7, s=2, p=3) + MaxPool2d(3, s=2, p=1)
    w, b = params['stem_conv']
    x = conv_im2col(x, w, b, stride=2, pad=3)
    x = maxpool2d_3x3_s2_p1(x)

    for stage in params['blocks']:
        # DenseBlock: outputs = concat(outputs, layer(outputs)) per layer
        for layer in stage['dense']:
            g, be = layer['bn']
            w, b = layer['conv']
            h = dense_layer(x, g, be, w, b)          # fused BN+ReLU+Conv3x3
            # TODO(synk): per-layer concat stays as plain-JAX glue; an in-place
            # channel-slab write (input_output_aliases) would cut these copies too.
            x = jnp.concatenate([x, h], axis=-1)
        # Dropout2d(p=0) -> identity
        if 'down' in stage:
            g, be = stage['down']['bn']
            w, b = stage['down']['conv']
            x = downsample(x, g, be, w, b)           # BN -> Conv1x1 -> AvgPool2d(2)

    # FC head: AdaptiveAvgPool2d((1,1)) + Flatten + Linear
    feat = global_avgpool(x)                         # (N, C)
    wfc, bfc = params['fc']
    return matmul_bias(feat, wfc.astype(jnp.bfloat16), bfc)       # (N, num_classes)


# --------------------------------------------------------------------------
if __name__ == "__main__":
    key = jax.random.PRNGKey(0)
    kp, kx = jax.random.split(key)

    K_GROWTH = 4
    THETA = 0.5
    ARCHI = '121'
    NUM_CLASSES = 10

    params = build_densenet_params(kp, K_GROWTH, THETA, ARCHI, NUM_CLASSES)
    x = jax.random.normal(kx, (2, 3, 32, 32), jnp.float32)   # small NCHW input

    out = densenet_forward(params, x)
    out = jax.block_until_ready(out)
    assert out.shape == (2, NUM_CLASSES)
    assert bool(jnp.all(jnp.isfinite(out)))
    print("KERNEL_OK")
</pallas_src>

<mosaic_0001>
module attributes {stable_mosaic.version = 11 : i64} {
  func.func @_matmul_bias_kernel(%arg0: i32, %arg1: memref<256x147xf32, #tpu.memory_space<vmem>>, %arg2: memref<147x8xbf16, #tpu.memory_space<vmem>>, %arg3: memref<1x8xf32, #tpu.memory_space<vmem>>, %arg4: memref<256x8xf32, #tpu.memory_space<vmem>>) attributes {dimension_semantics = [#tpu.dimension_semantics<parallel>], iteration_bounds = array<i64: 2>, scalar_prefetch = 0 : i64, scratch_operands = 0 : i64, tpu.core_type = #tpu.core_type<tc>, window_params = [{transform_indices = @transform_0, window_bounds = array<i64: 256, 147>}, {pipeline_mode = #tpu.pipeline_mode<synchronous>, transform_indices = @transform_1, window_bounds = array<i64: 147, 8>}, {pipeline_mode = #tpu.pipeline_mode<synchronous>, transform_indices = @transform_2, window_bounds = array<i64: 1, 8>}, {transform_indices = @transform_3, window_bounds = array<i64: 256, 8>}]} {
    %c0 = arith.constant 0 : index
    %c0_0 = arith.constant 0 : index
    %0 = vector.load %arg1[%c0, %c0_0] : memref<256x147xf32, #tpu.memory_space<vmem>>, vector<256x147xf32>
    %1 = arith.truncf %0 : vector<256x147xf32> to vector<256x147xbf16>
    %c0_1 = arith.constant 0 : index
    %c0_2 = arith.constant 0 : index
    %2 = vector.load %arg2[%c0_1, %c0_2] : memref<147x8xbf16, #tpu.memory_space<vmem>>, vector<147x8xbf16>
    %cst = arith.constant dense<0.000000e+00> : vector<256x8xf32>
    %3 = tpu.matmul %1, %2, %cst {dimension_numbers = #tpu.dot_dimension_numbers<[1], [0], [0], [1], [0, 0, 1, 1], [], []>} : vector<256x147xbf16>, vector<147x8xbf16>, vector<256x8xf32> -> vector<256x8xf32>
    %c0_3 = arith.constant 0 : index
    %c0_4 = arith.constant 0 : index
    %4 = vector.load %arg3[%c0_3, %c0_4] : memref<1x8xf32, #tpu.memory_space<vmem>>, vector<1x8xf32>
    %5 = vector.broadcast %4 : vector<1x8xf32> to vector<256x8xf32>
    %6 = arith.addf %3, %5 : vector<256x8xf32>
    %c0_5 = arith.constant 0 : index
    %c0_6 = arith.constant 0 : index
    %7 = vector.load %arg4[%c0_5, %c0_6] : memref<256x8xf32, #tpu.memory_space<vmem>>, vector<256x8xf32>
    tpu.vector_store %arg4[%c0_5, %c0_6], %6 {strides = array<i32>} : memref<256x8xf32, #tpu.memory_space<vmem>>, vector<256x8xf32>,
    return
  }
  func.func @transform_0(%arg0: i32) -> (i32, i32) {
    %c0_i32 = arith.constant 0 : i32
    %c0_i32_0 = arith.constant 0 : i32
    return %arg0, %c0_i32 : i32, i32
  }
  func.func @transform_1(%arg0: i32) -> (i32, i32) {
    %c0_i32 = arith.constant 0 : i32
    %c0_i32_0 = arith.constant 0 : i32
    %c0_i32_1 = arith.constant 0 : i32
    return %c0_i32, %c0_i32_0 : i32, i32
  }
  func.func @transform_2(%arg0: i32) -> (i32, i32) {
    %c0_i32 = arith.constant 0 : i32
    %c0_i32_0 = arith.constant 0 : i32
    %c0_i32_1 = arith.constant 0 : i32
    return %c0_i32, %c0_i32_0 : i32, i32
  }
  func.func @transform_3(%arg0: i32) -> (i32, i32) {
    %c0_i32 = arith.constant 0 : i32
    %c0_i32_0 = arith.constant 0 : i32
    return %arg0, %c0_i32 : i32, i32
  }
}

</mosaic_0001>

<bundles_post_ra>
// kernel: tpu_custom_call.1
= control target key start
LH: loop header
LB: loop body
LE: loop exit
PB: predicated region body
PF: predicated region fallthrough
CT: control target
= control target key end

     0   :  { %s800_s12 = smov 0   ;;  %s1042_s0 = inlined_call_operand.vmem [shape: f32[512,147], index: 0, kind: input, shape index: {}]   ;;  %s1043_s1 = inlined_call_operand.vmem [shape: bf16[147,8], index: 1, kind: input, shape index: {}]   ;;  %s1044_s2 = inlined_call_operand.vmem [shape: f32[1,8], index: 2, kind: input, shape index: {}]   ;;  %s1045_s3 = inlined_call_operand.vmem [shape: f32[512,8], index: 3, kind: output, shape index: {}]  }
   0x1 LB: > { %s677_s13 = sadd.s32 4294967295, %s777_s12   ;;  %p681_p0 = scmp.ge.s32.totalorder %s777_s12, 1  ;;  %s777_s12 = sphi %s800_s12, %s13_s12  }
   0x2   : > { %p139_p1 = scmp.lt.s32.totalorder %s777_s12, 3 }
   0x4   : > { %p140_p2 = pnand %p681_p0, %p139_p1 }
   0x5   : > { %s682_s18 = sshll.u32 (!%p140_p2), %s677_s13, 5 }
   0x6   : > { %143 = sbr.rel (%p140_p2) target bundleno = 300 (0x12c), region = 32  ;;  %p165_p3 = scmp.lt.s32.totalorder (!%p140_p2), %s682_s18, 63 }
   0xb   : > { %v749_v0 = vld [vmem:[%s1043_s1 + $0x38] sm:$0xff]  ;;  %v292_v1 = vld [vmem:[%s1043_s1 + $0x48] sm:$0x3]  ;;  %vm403_vm0 = vcmask 1040384   ;;  %vm404_vm1 = vcmask 1041408   ;;  %v748_v3 = vld [vmem:[%s1043_s1 + $0x30] sm:$0xff] }
   0xc   : > { %v334_v2 = vunpack.c.l.b16 %v292_v1  ;;  %410 = vmatpush.bf16.msra.mxu0 %v749_v0  ;;  %751 = vmatpush.bf16.msra.mxu2 %v749_v0  ;;  %v779_v4 = vmov 65535   ;;  %s1047_s18 = smov (!%p165_p3, %s682_s18), 63  ;;  %v747_v9 = vld [vmem:[%s1043_s1 + $0x28] sm:$0xff]  ;;  %v750_v10 = vld [vmem:[%s1043_s1 + $0x40] sm:$0xff]  ;;  %vm354_vm2 = vcmask 154624   ;;  %v745_v18 = vld [vmem:[%s1043_s1 + $0x18] sm:$0xff] }
   0xd   : > { %v405_v5 = vsel %vm403_vm0, 4294967295, %v779_v4  ;;  %s741_s23 = sshll.u32 %s1047_s18, 4  ;;  %v746_v14 = vld [vmem:[%s1043_s1 + $0x20] sm:$0xff]  ;;  %v744_v19 = vld [vmem:[%s1043_s1 + $0x10] sm:$0xff]  ;;  %v743_v20 = vld [vmem:[%s1043_s1 + $0x8] sm:$0xff]  ;;  %s686_s15 = sshll.u32 %s1047_s18, 3 }
   0xe   : > { %v344_v6 = vpack.c.b16 %v334_v2, %v334_v2  ;;  %v406_v7 = vsel %vm404_vm1, %v405_v5, 0  ;;  %s829_s28 = scalar_lea.vmem %s1042_s0, %s741_s23  ;;  %v742_v26 = vld [vmem:[%s1043_s1] sm:$0xff]  ;;  %s936_s19 = scalar_lea.vmem %s1045_s3, %s686_s15  ;;  %vm588_vm3 = vcmask 64512  }
   0xf   : > { %v179_v11 = vld [vmem:[%s829_s28 + $0x8] sm:$0xff]  ;;  %v181_v12 = vld [vmem:[%s829_s28 + $0x18] sm:$0xff]  ;;  %v178_v27 = vld [vmem:[%s829_s28] sm:$0xff] }
  0x10   : > { %v408_v8 = vand.u32 %v406_v7, %v344_v6  ;;  %411 = vmatpush.bf16.msra.mxu0 %v748_v3  ;;  %752 = vmatpush.bf16.msra.mxu2 %v748_v3  ;;  %v243_v13 = vpack.c.bf16 %v181_v12, %v179_v11  ;;  %v215_v15 = vld [vmem:[%s829_s28 + $0x128] sm:$0xff]  ;;  %v217_v16 = vld [vmem:[%s829_s28 + $0x138] sm:$0xff]  ;;  %v180_v28 = vld [vmem:[%s829_s28 + $0x10] sm:$0xff] }
  0x11   : > { %v261_v17 = vpack.c.bf16 %v217_v16, %v215_v15  ;;  %v183_v21 = vld [vmem:[%s829_s28 + $0x28] sm:$0xff]  ;;  %v185_v22 = vld [vmem:[%s829_s28 + $0x38] sm:$0xff]  ;;  %v210_v29 = vld [vmem:[%s829_s28 + $0x100] sm:$0xff]  ;;  %v242_v32 = vpack.c.bf16 %v180_v28, %v178_v27 }
  0x12   : > { %505 = vmatpush.bf16.msra.mxu1 %v408_v8  ;;  %759 = vmatpush.bf16.msra.mxu3 %v408_v8  ;;  %v219_v23 = vld [vmem:[%s829_s28 + $0x148] sm:$0xff]  ;;  %v221_v24 = vld [vmem:[%s829_s28 + $0x158] sm:$0xff]  ;;  %v245_v25 = vpack.c.bf16 %v185_v22, %v183_v21  ;;  %v212_v30 = vld [vmem:[%s829_s28 + $0x110] sm:$0xff] }
  0x13   : > { %v263_v31 = vpack.c.bf16 %v221_v24, %v219_v23  ;;  %v258_v33 = vpack.c.bf16 %v212_v30, %v210_v29  ;;  %v187_v34 = vld [vmem:[%s829_s28 + $0x48] sm:$0xff]  ;;  %v189_v35 = vld [vmem:[%s829_s28 + $0x58] sm:$0xff]  ;;  %v182_v39 = vld [vmem:[%s829_s28 + $0x20] sm:$0xff] }
  0x14   : > { %412 = vmatpush.bf16.msra.mxu0 %v747_v9  ;;  %753 = vmatpush.bf16.msra.mxu2 %v747_v9  ;;  %v223_v36 = vld [vmem:[%s829_s28 + $0x168] sm:$0xff]  ;;  %v225_v37 = vld [vmem:[%s829_s28 + $0x178] sm:$0xff]  ;;  %v247_v38 = vpack.c.bf16 %v189_v35, %v187_v34  ;;  %v184_v40 = vld [vmem:[%s829_s28 + $0x30] sm:$0xff] }
  0x15   : > { %v214_v41 = vld [vmem:[%s829_s28 + $0x120] sm:$0xff]  ;;  %v216_v42 = vld [vmem:[%s829_s28 + $0x130] sm:$0xff]  ;;  %v265_v43 = vpack.c.bf16 %v225_v37, %v223_v36  ;;  %v244_v44 = vpack.c.bf16 %v184_v40, %v182_v39  ;;  %v191_v46 = vld [vmem:[%s829_s28 + $0x68] sm:$0xff] }
  0x16   : > { %506 = vmatpush.bf16.msra.mxu1 %v750_v10  ;;  %760 = vmatpush.bf16.msra.mxu3 %v750_v10  ;;  %v260_v45 = vpack.c.bf16 %v216_v42, %v214_v41  ;;  %v193_v47 = vld [vmem:[%s829_s28 + $0x78] sm:$0xff]  ;;  %v227_v48 = vld [vmem:[%s829_s28 + $0x188] sm:$0xff]  ;;  %v186_v51 = vld [vmem:[%s829_s28 + $0x40] sm:$0xff] }
  0x17   : > { %v229_v49 = vld [vmem:[%s829_s28 + $0x198] sm:$0xff]  ;;  %v249_v50 = vpack.c.bf16 %v193_v47, %v191_v46  ;;  %v188_v52 = vld [vmem:[%s829_s28 + $0x50] sm:$0xff]  ;;  %v218_v53 = vld [vmem:[%s829_s28 + $0x140] sm:$0xff] }
  0x18   : > { %413 = vmatpush.bf16.msra.mxu0 %v746_v14  ;;  %754 = vmatpush.bf16.msra.mxu2 %v746_v14  ;;  %v220_v54 = vld [vmem:[%s829_s28 + $0x150] sm:$0xff]  ;;  %v267_v55 = vpack.c.bf16 %v229_v49, %v227_v48  ;;  %v246_v56 = vpack.c.bf16 %v188_v52, %v186_v51  ;;  %v195_v58 = vld [vmem:[%s829_s28 + $0x88] sm:$0xff]  ;;  %v197_v59 = vld [vmem:[%s829_s28 + $0x98] sm:$0xff] }
  0x19   : > { %723 = vmatmul.msk.bf16.vlgmr.msra.gmra.mxu1 %vm354_vm2, %v243_v13  ;;  %732 = vmatmul.msk.bf16.vlgmr.msra.gmra.mxu3 %vm354_vm2, %v261_v17  ;;  %v262_v57 = vpack.c.bf16 %v220_v54, %v218_v53  ;;  %v231_v60 = vld [vmem:[%s829_s28 + $0x1a8] sm:$0xff]  ;;  %v233_v61 = vld [vmem:[%s829_s28 + $0x1b8] sm:$0xff]  ;;  %v251_v62 = vpack.c.bf16 %v197_v59, %v195_v58  ;;  %v190_v63 = vld [vmem:[%s829_s28 + $0x60] sm:$0xff] }
  0x1a   : > { %v192_v0 = vld [vmem:[%s829_s28 + $0x70] sm:$0xff]  ;;  %v222_v1 = vld [vmem:[%s829_s28 + $0x160] sm:$0xff]  ;;  %v269_v3 = vpack.c.bf16 %v233_v61, %v231_v60  ;;  %v199_v6 = vld [vmem:[%s829_s28 + $0xa8] sm:$0xff] }
  0x1b   : > { %v224_v2 = vld [vmem:[%s829_s28 + $0x170] sm:$0xff]  ;;  %v248_v4 = vpack.c.bf16 %v192_v0, %v190_v63  ;;  %v201_v7 = vld [vmem:[%s829_s28 + $0xb8] sm:$0xff]  ;;  %v235_v8 = vld [vmem:[%s829_s28 + $0x1c8] sm:$0xff] }
  0x1c   : > { %414 = vmatpush.bf16.msra.mxu0 %v745_v18  ;;  %755 = vmatpush.bf16.msra.mxu2 %v745_v18  ;;  %v264_v5 = vpack.c.bf16 %v224_v2, %v222_v1  ;;  %v237_v9 = vld [vmem:[%s829_s28 + $0x1d8] sm:$0xff]  ;;  %v253_v10 = vpack.c.bf16 %v201_v7, %v199_v6  ;;  %v194_v11 = vld [vmem:[%s829_s28 + $0x80] sm:$0xff]  ;;  %v196_v12 = vld [vmem:[%s829_s28 + $0x90] sm:$0xff] }
  0x1d   : > { %v226_v13 = vld [vmem:[%s829_s28 + $0x180] sm:$0xff]  ;;  %v228_v14 = vld [vmem:[%s829_s28 + $0x190] sm:$0xff]  ;;  %v271_v15 = vpack.c.bf16 %v237_v9, %v235_v8  ;;  %v250_v16 = vpack.c.bf16 %v196_v12, %v194_v11  ;;  %v203_v18 = vld [vmem:[%s829_s28 + $0xc8] sm:$0xff] }
  0x1e   : > { %v266_v17 = vpack.c.bf16 %v228_v14, %v226_v13  ;;  %v241_v21 = vld [vmem:[%s829_s28 + $0x1f8] sm:$0xff]  ;;  %v198_v23 = vld [vmem:[%s829_s28 + $0xa0] sm:$0xff]  ;;  %v200_v24 = vld [vmem:[%s829_s28 + $0xb0] sm:$0xff] }
  0x1f   : > { %v252_v28 = vpack.c.bf16 %v200_v24, %v198_v23  ;;  %v207_v30 = vld [vmem:[%s829_s28 + $0xe8] sm:$0xff]  ;;  %v204_v34 = vld [vmem:[%s829_s28 + $0xd0] sm:$0xff]  ;;  %v234_v35 = vld [vmem:[%s829_s28 + $0x1c0] sm:$0xff] }
  0x20   : > { %415 = vmatpush.bf16.msra.mxu0 %v744_v19  ;;  %756 = vmatpush.bf16.msra.mxu2 %v744_v19  ;;  %v205_v19 = vld [vmem:[%s829_s28 + $0xd8] sm:$0xff]  ;;  %v236_v36 = vld [vmem:[%s829_s28 + $0x1d0] sm:$0xff]  ;;  %v211_v39 = vld [vmem:[%s829_s28 + $0x108] sm:$0xff] }
  0x21   : > { %v255_v22 = vpack.c.bf16 %v205_v19, %v203_v18  ;;  %v213_v40 = vld [vmem:[%s829_s28 + $0x118] sm:$0xff]  ;;  %v206_v42 = vld [vmem:[%s829_s28 + $0xe0] sm:$0xff]  ;;  %v240_v46 = vld [vmem:[%s829_s28 + $0x1f0] sm:$0xff] }
  0x22   : > { %v259_v41 = vpack.c.bf16 %v213_v40, %v211_v39  ;;  %v929_v51 = vld [vmem:[%s1044_s2] ss:$0 sm:$0xff] }
  0x24   : > { %416 = vmatpush.bf16.msra.mxu0 %v743_v20  ;;  %757 = vmatpush.bf16.msra.mxu2 %v743_v20  ;;  %v239_v20 = vld [vmem:[%s829_s28 + $0x1e8] sm:$0xff] }
  0x25   : > { %v273_v27 = vpack.c.bf16 %v241_v21, %v239_v20 }
  0x28   : > { %417 = vmatpush.bf16.msra.mxu0 %v742_v26  ;;  %758 = vmatpush.bf16.msra.mxu2 %v742_v26  ;;  %v232_v26 = vld [vmem:[%s829_s28 + $0x1b0] sm:$0xff] }
  0x29   : > { %724 = vmatmul.msk.bf16.gmra.mxu1 %vm354_vm2, %v245_v25  ;;  %733 = vmatmul.msk.bf16.gmra.mxu3 %vm354_vm2, %v263_v31  ;;  %v230_v25 = vld [vmem:[%s829_s28 + $0x1a0] sm:$0xff]  ;;  %v209_v31 = vld [vmem:[%s829_s28 + $0xf8] sm:$0xff] }
  0x2a   : > { %v268_v29 = vpack.c.bf16 %v232_v26, %v230_v25 }
  0x2b   : > { %418 = vmatmul.bf16.vlgmr.msra.gmra.mxu0 %v242_v32  ;;  %458 = vmatmul.bf16.vlgmr.msra.gmra.mxu2 %v258_v33  ;;  %v257_v32 = vpack.c.bf16 %v209_v31, %v207_v30  ;;  %v202_v33 = vld [vmem:[%s829_s28 + $0xc0] sm:$0xff] }
  0x2c   : > { %v254_v37 = vpack.c.bf16 %v204_v34, %v202_v33 }
  0x39   : > { %725 = vmatmul.msk.bf16.gmra.mxu1 %vm354_vm2, %v247_v38  ;;  %734 = vmatmul.msk.bf16.gmra.mxu3 %vm354_vm2, %v265_v43  ;;  %v270_v38 = vpack.c.bf16 %v236_v36, %v234_v35  ;;  %v208_v43 = vld [vmem:[%s829_s28 + $0xf0] sm:$0xff] }
  0x3a   : > { %v256_v47 = vpack.c.bf16 %v208_v43, %v206_v42 }
  0x3b   : > { %423 = vmatmul.bf16.gmra.mxu0 %v244_v44  ;;  %463 = vmatmul.bf16.gmra.mxu2 %v260_v45  ;;  %v238_v45 = vld [vmem:[%s829_s28 + $0x1e0] sm:$0xff] }
  0x3c   : > { %v272_v48 = vpack.c.bf16 %v240_v46, %v238_v45 }
  0x49   : > { %726 = vmatmul.msk.bf16.gmra.mxu1 %vm354_vm2, %v249_v50  ;;  %735 = vmatmul.msk.bf16.gmra.mxu3 %vm354_vm2, %v267_v55 }
  0x4b   : > { %428 = vmatmul.bf16.gmra.mxu0 %v246_v56  ;;  %468 = vmatmul.bf16.gmra.mxu2 %v262_v57 }
  0x59   : > { %727 = vmatmul.msk.bf16.gmra.mxu1 %vm354_vm2, %v251_v62  ;;  %736 = vmatmul.msk.bf16.gmra.mxu3 %vm354_vm2, %v269_v3 }
  0x5b   : > { %433 = vmatmul.bf16.gmra.mxu0 %v248_v4  ;;  %473 = vmatmul.bf16.gmra.mxu2 %v264_v5 }
  0x69   : > { %728 = vmatmul.msk.bf16.gmra.mxu1 %vm354_vm2, %v253_v10  ;;  %737 = vmatmul.msk.bf16.gmra.mxu3 %vm354_vm2, %v271_v15 }
  0x6b   : > { %438 = vmatmul.bf16.gmra.mxu0 %v250_v16  ;;  %478 = vmatmul.bf16.gmra.mxu2 %v266_v17 }
  0x79   : > { %729 = vmatmul.msk.bf16.gmra.mxu1 %vm354_vm2, %v255_v22  ;;  %738 = vmatmul.msk.bf16.gmra.mxu3 %vm354_vm2, %v273_v27 }
  0x7b   : > { %443 = vmatmul.bf16.gmra.mxu0 %v252_v28  ;;  %483 = vmatmul.bf16.gmra.mxu2 %v268_v29 }
  0x89   : > { %730 = vmatmul.msk.bf16.gmra.mxu1 %vm354_vm2, %v257_v32 }
  0x8b   : > { %448 = vmatmul.bf16.gmra.mxu0 %v254_v37  ;;  %488 = vmatmul.bf16.gmra.mxu2 %v270_v38 }
  0x96   : > { %v508_v44 = vpop.f32.mrf.mxu1 }
  0x99   : > { %731 = vmatmul.msk.bf16.gmra.mxu1 %vm354_vm2, %v259_v41 }
  0x9b   : > { %453 = vmatmul.bf16.gmra.mxu0 %v256_v47  ;;  %493 = vmatmul.bf16.gmra.mxu2 %v272_v48 }
  0x9c   : > { %v553_v52 = vpop.f32.mrf.mxu3 }
  0x9e   : > { %v510_v49 = vpop.f32.mrf.mxu1 }
  0xa4   : > { %v555_v60 = vpop.f32.mrf.mxu3 }
  0xa6   : > { %v513_v50 = vpop.f32.mrf.mxu1 }
  0xa8   : > { %v419_v53 = vpop.f32.mrf.mxu0 }
  0xa9   : > { %v420_v54 = vadd.f32 %v929_v51, %v419_v53 }
  0xab   : > { %v509_v55 = vadd.f32 %v508_v44, %v420_v54 }
  0xac   : > { %v558_v3 = vpop.f32.mrf.mxu3 }
  0xad   : > { %589 = vst.msk [vmem:[%s936_s19] sm:$0xff] %vm588_vm3, %v509_v55 }
  0xae   : > { %v515_v56 = vpop.f32.mrf.mxu1  ;;  %v940_v57 = vpop.f32.mrf.mxu2 }
  0xb0   : > { %v421_v58 = vpop.f32.mrf.mxu0 }
  0xb1   : > { %v422_v59 = vadd.f32 %v929_v51, %v421_v58 }
  0xb3   : > { %v511_v61 = vadd.f32 %v510_v49, %v422_v59 }
  0xb4   : > { %v560_v12 = vpop.f32.mrf.mxu3 }
  0xb5   : > { %590 = vst.msk [vmem:[%s936_s19 + $0x8] sm:$0xff] %vm588_vm3, %v511_v61 }
  0xb6   : > { %v518_v62 = vpop.f32.mrf.mxu1  ;;  %v945_v63 = vpop.f32.mrf.mxu2 }
  0xb8   : > { %v424_v0 = vpop.f32.mrf.mxu0 }
  0xb9   : > { %v425_v1 = vadd.f32 %v929_v51, %v424_v0 }
  0xbb   : > { %v514_v2 = vadd.f32 %v513_v50, %v425_v1 }
  0xbc   : > { %v563_v21 = vpop.f32.mrf.mxu3 }
  0xbd   : > { %591 = vst.msk [vmem:[%s936_s19 + $0x10] sm:$0xff] %vm588_vm3, %v514_v2 }
  0xbe   : > { %v520_v4 = vpop.f32.mrf.mxu1  ;;  %v464_v5 = vpop.f32.mrf.mxu2 }
  0xbf   : > { %v465_v6 = vadd.f32 %v929_v51, %v464_v5 }
  0xc0   : > { %v426_v7 = vpop.f32.mrf.mxu0 }
  0xc1   : > { %v427_v8 = vadd.f32 %v929_v51, %v426_v7  ;;  %v554_v9 = vadd.f32 %v553_v52, %v465_v6 }
  0xc3   : > { %v516_v10 = vadd.f32 %v515_v56, %v427_v8  ;;  %607 = vst.msk [vmem:[%s936_s19 + $0x90] sm:$0xff] %vm588_vm3, %v554_v9 }
  0xc4   : > { %v565_v32 = vpop.f32.mrf.mxu3 }
  0xc5   : > { %592 = vst.msk [vmem:[%s936_s19 + $0x18] sm:$0xff] %vm588_vm3, %v516_v10 }
  0xc6   : > { %v523_v11 = vpop.f32.mrf.mxu1  ;;  %v466_v13 = vpop.f32.mrf.mxu2 }
  0xc7   : > { %v467_v14 = vadd.f32 %v929_v51, %v466_v13 }
  0xc8   : > { %v429_v15 = vpop.f32.mrf.mxu0 }
  0xc9   : > { %v430_v16 = vadd.f32 %v929_v51, %v429_v15  ;;  %v556_v17 = vadd.f32 %v555_v60, %v467_v14 }
  0xcb   : > { %v519_v18 = vadd.f32 %v518_v62, %v430_v16  ;;  %608 = vst.msk [vmem:[%s936_s19 + $0x98] sm:$0xff] %vm588_vm3, %v556_v17 }
  0xcc   : > { %v568_v42 = vpop.f32.mrf.mxu3 }
  0xcd   : > { %593 = vst.msk [vmem:[%s936_s19 + $0x20] sm:$0xff] %vm588_vm3, %v519_v18 }
  0xce   : > { %v525_v19 = vpop.f32.mrf.mxu1  ;;  %v469_v20 = vpop.f32.mrf.mxu2 }
  0xcf   : > { %v470_v22 = vadd.f32 %v929_v51, %v469_v20 }
  0xd0   : > { %v431_v23 = vpop.f32.mrf.mxu0 }
  0xd1   : > { %v432_v24 = vadd.f32 %v929_v51, %v431_v23  ;;  %v559_v25 = vadd.f32 %v558_v3, %v470_v22 }
  0xd3   : > { %v521_v26 = vadd.f32 %v520_v4, %v432_v24  ;;  %609 = vst.msk [vmem:[%s936_s19 + $0xa0] sm:$0xff] %vm588_vm3, %v559_v25 }
  0xd4   : > { %v570_v52 = vpop.f32.mrf.mxu3 }
  0xd5   : > { %594 = vst.msk [vmem:[%s936_s19 + $0x28] sm:$0xff] %vm588_vm3, %v521_v26 }
  0xd6   : > { %v528_v27 = vpop.f32.mrf.mxu1  ;;  %v471_v28 = vpop.f32.mrf.mxu2 }
  0xd7   : > { %v472_v29 = vadd.f32 %v929_v51, %v471_v28  ;;  %v460_v28 = vadd.f32 %v929_v51, %v940_v57 }
  0xd8   : > { %v434_v30 = vpop.f32.mrf.mxu0 }
  0xd9   : > { %v435_v31 = vadd.f32 %v929_v51, %v434_v30  ;;  %v561_v33 = vadd.f32 %v560_v12, %v472_v29 }
  0xdb   : > { %v524_v34 = vadd.f32 %v523_v11, %v435_v31  ;;  %610 = vst.msk [vmem:[%s936_s19 + $0xa8] sm:$0xff] %vm588_vm3, %v561_v33 }
  0xdc   : > { %v573_v62 = vpop.f32.mrf.mxu3 }
  0xdd   : > { %595 = vst.msk [vmem:[%s936_s19 + $0x30] sm:$0xff] %vm588_vm3, %v524_v34 }
  0xde   : > { %v530_v35 = vpop.f32.mrf.mxu1  ;;  %v474_v36 = vpop.f32.mrf.mxu2 }
  0xdf   : > { %v475_v37 = vadd.f32 %v929_v51, %v474_v36 }
  0xe0   : > { %v436_v38 = vpop.f32.mrf.mxu0 }
  0xe1   : > { %v437_v39 = vadd.f32 %v929_v51, %v436_v38  ;;  %v564_v40 = vadd.f32 %v563_v21, %v475_v37  ;;  %v462_v37 = vadd.f32 %v929_v51, %v945_v63 }
  0xe3   : > { %v526_v41 = vadd.f32 %v525_v19, %v437_v39  ;;  %611 = vst.msk [vmem:[%s936_s19 + $0xb0] sm:$0xff] %vm588_vm3, %v564_v40 }
  0xe4   : > { %v575_v10 = vpop.f32.mrf.mxu3 }
  0xe5   : > { %596 = vst.msk [vmem:[%s936_s19 + $0x38] sm:$0xff] %vm588_vm3, %v526_v41 }
  0xe6   : > { %v533_v43 = vpop.f32.mrf.mxu1  ;;  %v476_v44 = vpop.f32.mrf.mxu2 }
  0xe7   : > { %v477_v45 = vadd.f32 %v929_v51, %v476_v44 }
  0xe8   : > { %v439_v46 = vpop.f32.mrf.mxu0 }
  0xe9   : > { %v440_v47 = vadd.f32 %v929_v51, %v439_v46  ;;  %v566_v48 = vadd.f32 %v565_v32, %v477_v45 }
  0xeb   : > { %v529_v49 = vadd.f32 %v528_v27, %v440_v47  ;;  %612 = vst.msk [vmem:[%s936_s19 + $0xb8] sm:$0xff] %vm588_vm3, %v566_v48 }
  0xec   : > { %v578_v20 = vpop.f32.mrf.mxu3 }
  0xed   : > { %597 = vst.msk [vmem:[%s936_s19 + $0x40] sm:$0xff] %vm588_vm3, %v529_v49 }
  0xee   : > { %v535_v50 = vpop.f32.mrf.mxu1  ;;  %v479_v53 = vpop.f32.mrf.mxu2 }
  0xef   : > { %v480_v54 = vadd.f32 %v929_v51, %v479_v53 }
  0xf0   : > { %v441_v55 = vpop.f32.mrf.mxu0 }
  0xf1   : > { %v442_v56 = vadd.f32 %v929_v51, %v441_v55  ;;  %v569_v58 = vadd.f32 %v568_v42, %v480_v54 }
  0xf3   : > { %v531_v59 = vadd.f32 %v530_v35, %v442_v56  ;;  %613 = vst.msk [vmem:[%s936_s19 + $0xc0] sm:$0xff] %vm588_vm3, %v569_v58 }
  0xf4   : > { %v580_v29 = vpop.f32.mrf.mxu3 }
  0xf5   : > { %598 = vst.msk [vmem:[%s936_s19 + $0x48] sm:$0xff] %vm588_vm3, %v531_v59 }
  0xf6   : > { %v538_v60 = vpop.f32.mrf.mxu1  ;;  %v481_v61 = vpop.f32.mrf.mxu2 }
  0xf7   : > { %v482_v0 = vadd.f32 %v929_v51, %v481_v61 }
  0xf8   : > { %v444_v1 = vpop.f32.mrf.mxu0 }
  0xf9   : > { %v445_v2 = vadd.f32 %v929_v51, %v444_v1  ;;  %v571_v3 = vadd.f32 %v570_v52, %v482_v0 }
  0xfb   : > { %v534_v4 = vadd.f32 %v533_v43, %v445_v2  ;;  %614 = vst.msk [vmem:[%s936_s19 + $0xc8] sm:$0xff] %vm588_vm3, %v571_v3 }
  0xfc   : > { %v583_v40 = vpop.f32.mrf.mxu3 }
  0xfd   : > { %599 = vst.msk [vmem:[%s936_s19 + $0x50] sm:$0xff] %vm588_vm3, %v534_v4 }
  0xfe   : > { %v540_v5 = vpop.f32.mrf.mxu1  ;;  %v484_v6 = vpop.f32.mrf.mxu2 }
  0xff   : > { %v485_v7 = vadd.f32 %v929_v51, %v484_v6 }
 0x100   : > { %v446_v8 = vpop.f32.mrf.mxu0 }
 0x101   : > { %v447_v9 = vadd.f32 %v929_v51, %v446_v8  ;;  %v574_v11 = vadd.f32 %v573_v62, %v485_v7 }
 0x103   : > { %v536_v12 = vadd.f32 %v535_v50, %v447_v9  ;;  %615 = vst.msk [vmem:[%s936_s19 + $0xd0] sm:$0xff] %vm588_vm3, %v574_v11 }
 0x104   : > { %v585_v48 = vpop.f32.mrf.mxu3 }
 0x105   : > { %600 = vst.msk [vmem:[%s936_s19 + $0x58] sm:$0xff] %vm588_vm3, %v536_v12 }
 0x106   : > { %v543_v13 = vpop.f32.mrf.mxu1  ;;  %v486_v14 = vpop.f32.mrf.mxu2 }
 0x107   : > { %v487_v15 = vadd.f32 %v929_v51, %v486_v14 }
 0x108   : > { %v449_v16 = vpop.f32.mrf.mxu0 }
 0x109   : > { %v450_v17 = vadd.f32 %v929_v51, %v449_v16  ;;  %v576_v18 = vadd.f32 %v575_v10, %v487_v15 }
 0x10b   : > { %v539_v19 = vadd.f32 %v538_v60, %v450_v17  ;;  %616 = vst.msk [vmem:[%s936_s19 + $0xd8] sm:$0xff] %vm588_vm3, %v576_v18 }
 0x10d   : > { %601 = vst.msk [vmem:[%s936_s19 + $0x60] sm:$0xff] %vm588_vm3, %v539_v19 }
 0x10e   : > { %v545_v21 = vpop.f32.mrf.mxu1  ;;  %v489_v22 = vpop.f32.mrf.mxu2 }
 0x10f   : > { %v490_v23 = vadd.f32 %v929_v51, %v489_v22 }
 0x110   : > { %v451_v24 = vpop.f32.mrf.mxu0 }
 0x111   : > { %v452_v25 = vadd.f32 %v929_v51, %v451_v24  ;;  %v579_v26 = vadd.f32 %v578_v20, %v490_v23 }
 0x113   : > { %v541_v27 = vadd.f32 %v540_v5, %v452_v25  ;;  %617 = vst.msk [vmem:[%s936_s19 + $0xe0] sm:$0xff] %vm588_vm3, %v579_v26 }
 0x115   : > { %602 = vst.msk [vmem:[%s936_s19 + $0x68] sm:$0xff] %vm588_vm3, %v541_v27 }
 0x116   : > { %v548_v30 = vpop.f32.mrf.mxu1  ;;  %v491_v32 = vpop.f32.mrf.mxu2 }
 0x117   : > { %v549_v31 = vadd.f32 %v548_v30, %v460_v28  ;;  %v492_v33 = vadd.f32 %v929_v51, %v491_v32 }
 0x118   : > { %v454_v34 = vpop.f32.mrf.mxu0 }
 0x119   : > { %605 = vst.msk [vmem:[%s936_s19 + $0x80] sm:$0xff] %vm588_vm3, %v549_v31  ;;  %v455_v35 = vadd.f32 %v929_v51, %v454_v34  ;;  %v581_v36 = vadd.f32 %v580_v29, %v492_v33 }
 0x11b   : > { %v544_v57 = vadd.f32 %v543_v13, %v455_v35  ;;  %618 = vst.msk [vmem:[%s936_s19 + $0xe8] sm:$0xff] %vm588_vm3, %v581_v36 }
 0x11d   : > { %603 = vst.msk [vmem:[%s936_s19 + $0x70] sm:$0xff] %vm588_vm3, %v544_v57 }
 0x11e   : > { %v550_v38 = vpop.f32.mrf.mxu1  ;;  %v494_v41 = vpop.f32.mrf.mxu2 }
 0x11f   : > { %v551_v39 = vadd.f32 %v550_v38, %v462_v37  ;;  %v495_v42 = vadd.f32 %v929_v51, %v494_v41 }
 0x120   : > { %v456_v43 = vpop.f32.mrf.mxu0 }
 0x121   : > { %606 = vst.msk [vmem:[%s936_s19 + $0x88] sm:$0xff] %vm588_vm3, %v551_v39  ;;  %v457_v44 = vadd.f32 %v929_v51, %v456_v43  ;;  %v584_v45 = vadd.f32 %v583_v40, %v495_v42 }
 0x123   : > { %v546_v46 = vadd.f32 %v545_v21, %v457_v44  ;;  %619 = vst.msk [vmem:[%s936_s19 + $0xf0] sm:$0xff] %vm588_vm3, %v584_v45 }
 0x125   : > { %604 = vst.msk [vmem:[%s936_s19 + $0x78] sm:$0xff] %vm588_vm3, %v546_v46 }
 0x126   : > { %v496_v63 = vpop.f32.mrf.mxu2 }
 0x127   : > { %v497_v47 = vadd.f32 %v929_v51, %v496_v63 }
 0x129   : > { %v586_v49 = vadd.f32 %v585_v48, %v497_v47 }
 0x12b   : > { %620 = vst.msk [vmem:[%s936_s19 + $0xf8] sm:$0xff] %vm588_vm3, %v586_v49 }
 0x12c PF: > { %s13_s12 = sadd.s32 1, %s777_s12  }
 0x12d   : > { %p10_p4 = scmp.ge.s32.totalorder %s13_s12, 4  }
 0x12f   :  { %12 = sbr.rel (!%p10_p4) target bundleno = 1 (0x1), region = 62 }

</bundles_post_ra>
